<compile_context>
chip_gen: v7x
topology: tpu7x:2x2x1
jax: 0.10.0
libtpu: 0.0.40
codegen_flags: <defaults>
</compile_context>

<pallas_src>
import functools
import math

import jax
import jax.numpy as jnp
from jax.experimental import pallas as pl
from jax.experimental.pallas import tpu as pltpu


def _round_up(v, m):
    return (v + m - 1) // m * m


def _vmem_block_bytes(shape, itemsize):
    """Approximate VMEM footprint of a block with (8, 128) tiling."""
    if len(shape) == 1:
        return _round_up(shape[0], 128) * itemsize
    lead = 1
    for d in shape[:-2]:
        lead *= d
    return lead * _round_up(shape[-2], 8) * _round_up(shape[-1], 128) * itemsize


def _phase_decompose_nhwc(x, kh, kw, stride, padding, oh_pad, ow):
    """Stride-phase decomposition of the zero-padded input (im2col-free).

    x: (N, C, H, W) NCHW.
    Returns phases of shape (N, S2*PH, PW, C) with S2 = stride*stride,
    PH = oh_pad + (kh-1)//stride, PW = ow + (kw-1)//stride, such that
        phases[n, (a*stride+b)*PH + r, q, c]
            == x_pad[n, c, a + r*stride, b + q*stride]
    (zero where past the padded image).  Total size is ~1x the input.
    """
    n, c, h, w = x.shape
    xp = jnp.pad(x, ((0, 0), (0, 0), (padding, padding), (padding, padding)))
    xp = jnp.transpose(xp, (0, 2, 3, 1))          # (N, Hp, Wp, C)
    dh = (kh - 1) // stride
    dw = (kw - 1) // stride
    ph = oh_pad + dh
    pw = ow + dw
    phases = []
    for a in range(stride):
        for b in range(stride):
            p = xp[:, a::stride, b::stride, :]    # (N, ~PH, ~PW, C)
            p = p[:, :ph, :pw, :]
            phases.append(jnp.pad(
                p, ((0, 0), (0, ph - p.shape[1]), (0, pw - p.shape[2]), (0, 0))))
    phases = jnp.stack(phases, axis=1)            # (N, S2, PH, PW, C)
    return phases.reshape(n, stride * stride * ph, pw, c), ph, pw


def _conv_tile_kernel(x_ref, w_ref, b_ref, o_ref, *, kh, kw, stride, ph,
                      rows_per_tile, ow):
    # x_ref: (S2*PH, PW, C)   stride-phase views of one padded image (resident)
    # w_ref: (KH*KW, C, OCp)  conv weights, tap-major (VMEM resident)
    # b_ref: (1, OCp)         bias (f32)
    # o_ref: (rows_per_tile*OW, OCp)  flattened row-tile of output pixels
    t = pl.program_id(1)
    m_tile, ocp = o_ref.shape
    oh0 = t * rows_per_tile
    # Start the f32 accumulator from the broadcast bias (saves a final add).
    acc = jnp.broadcast_to(b_ref[...].astype(jnp.float32), (m_tile, ocp))
    tap = 0
    for i in range(kh):                         # static unroll over taps
        a, di = i % stride, i // stride
        for j in range(kw):
            b, dj = j % stride, j // stride
            base = (a * stride + b) * ph + di + oh0
            xs = x_ref[pl.ds(base, rows_per_tile), pl.ds(dj, ow), :]
            xs = xs.reshape(m_tile, xs.shape[-1])          # (R*OW, C)
            acc = acc + jnp.dot(xs, w_ref[tap],
                                preferred_element_type=jnp.float32)
            tap += 1
    o_ref[...] = acc.astype(o_ref.dtype)


def downsampling_forward(x, weight, bias, *, stride, padding,
                         rows_per_tile=None, compute_dtype=None):
    """
    x:      (N, C_in, H, W)        (NCHW, as in PyTorch)
    weight: (C_out, C_in, KH, KW)  (PyTorch Conv2d layout)
    bias:   (C_out,)
    returns (N, OH, OW, C_out)     (NHWC, as the module outputs)
    """
    n, c_in, h, w = x.shape
    c_out, c_in_w, kh, kw = weight.shape
    assert c_in == c_in_w
    if compute_dtype is None:
        compute_dtype = x.dtype
    out_dtype = x.dtype

    hp, wp = h + 2 * padding, w + 2 * padding
    oh = (hp - kh) // stride + 1
    ow = (wp - kw) // stride + 1

    # Lane-dense output channels: pad OC up to a multiple of 128, slice later.
    ocp = _round_up(c_out, 128)

    # --- Row-tile (M-tile) selection -----------------------------------------
    # Target an MXU-friendly M of a few hundred rows while keeping the f32
    # accumulator within a modest budget (scales down for wide OC).
    if rows_per_tile is None:
        acc_budget = 256 * 1024                       # bytes of live f32 acc
        target_m = max(64, min(1024, acc_budget // (4 * ocp)))
        rows_per_tile = max(1, target_m // max(ow, 1))
    rows_per_tile = max(1, min(rows_per_tile, oh))
    n_row_tiles = pl.cdiv(oh, rows_per_tile)
    rows_per_tile = pl.cdiv(oh, n_row_tiles)          # balance the OH split
    if n_row_tiles > 1:
        # Keep the flattened M-tile (sublane dim of the store) a multiple of 8.
        r_align = 8 // math.gcd(ow, 8)
        rows_per_tile = min(oh, _round_up(rows_per_tile, r_align))
        n_row_tiles = pl.cdiv(oh, rows_per_tile)
    oh_pad = n_row_tiles * rows_per_tile
    m_tile = rows_per_tile * ow

    # ~1x-sized stride-phase view of the padded input (no im2col blow-up).
    phases, ph, pw = _phase_decompose_nhwc(x, kh, kw, stride, padding, oh_pad, ow)
    phases = phases.astype(compute_dtype)             # (N, S2*PH, PW, C)

    # (OC, C, KH, KW) -> (KH*KW, C, OCp); tap index = i*KW + j.
    w_taps = jnp.transpose(weight, (2, 3, 1, 0)).reshape(kh * kw, c_in, c_out)
    w_taps = jnp.pad(w_taps, ((0, 0), (0, 0), (0, ocp - c_out)))
    w_taps = w_taps.astype(compute_dtype)
    b_row = jnp.pad(bias, (0, ocp - c_out)).reshape(1, ocp).astype(jnp.float32)

    isz = jnp.dtype(compute_dtype).itemsize
    osz = jnp.dtype(out_dtype).itemsize
    vmem_bytes = (
        2 * _vmem_block_bytes((phases.shape[1], pw, c_in), isz)
        + 2 * _vmem_block_bytes((kh * kw, c_in, ocp), isz)
        + 2 * _vmem_block_bytes((1, ocp), 4)
        + 2 * _vmem_block_bytes((m_tile, ocp), osz)
        + _vmem_block_bytes((m_tile, ocp), 4)          # f32 accumulator
        + _vmem_block_bytes((m_tile, c_in), isz))      # per-tap patch slice
    vmem_limit = int(min(max(vmem_bytes + (4 << 20), 16 << 20), 64 << 20))

    kernel = functools.partial(
        _conv_tile_kernel, kh=kh, kw=kw, stride=stride, ph=ph,
        rows_per_tile=rows_per_tile, ow=ow)

    out = pl.pallas_call(
        kernel,
        out_shape=jax.ShapeDtypeStruct((n, n_row_tiles * m_tile, ocp), out_dtype),
        grid_spec=pltpu.PrefetchScalarGridSpec(
            num_scalar_prefetch=0,
            grid=(n, n_row_tiles),
            in_specs=[
                # Whole stride-phase stack for image `ni`; the block index is
                # constant along the row-tile axis so it stays VMEM-resident.
                pl.BlockSpec((None, phases.shape[1], pw, c_in),
                             lambda ni, ti: (ni, 0, 0, 0)),
                # Weights / bias: whole-array, VMEM resident.
                pl.BlockSpec((kh * kw, c_in, ocp), lambda ni, ti: (0, 0, 0)),
                pl.BlockSpec((1, ocp), lambda ni, ti: (0, 0)),
            ],
            out_specs=pl.BlockSpec((None, m_tile, ocp),
                                   lambda ni, ti: (ni, ti, 0)),
        ),
        compiler_params=pltpu.CompilerParams(
            dimension_semantics=("parallel", "parallel"),
            vmem_limit_bytes=vmem_limit),
    )(phases, w_taps, b_row)

    # Un-flatten rows and strip the OH / OC padding -> (N, OH, OW, OC) NHWC.
    out = out.reshape(n, oh_pad, ow, ocp)
    return out[:, :oh, :, :c_out]


if __name__ == "__main__":
    # Small shapes consistent with a downsampling stage:
    # in_channels=4, out_channels=8, kernel_size=3, stride=2, padding=1
    N, C_IN, H, W = 2, 4, 16, 16
    C_OUT, K, STRIDE, PAD = 8, 3, 2, 1

    key = jax.random.PRNGKey(0)
    kx, kw_, kb = jax.random.split(key, 3)
    x = jax.random.normal(kx, (N, C_IN, H, W), dtype=jnp.float32)
    weight = jax.random.normal(kw_, (C_OUT, C_IN, K, K), dtype=jnp.float32) * 0.1
    bias = jax.random.normal(kb, (C_OUT,), dtype=jnp.float32) * 0.1

    y = downsampling_forward(x, weight, bias, stride=STRIDE, padding=PAD)
    y = jax.block_until_ready(y)

    # Reference check against XLA's conv (NCHW conv, then permute to NHWC).
    ref = jax.lax.conv_general_dilated(
        x, weight, window_strides=(STRIDE, STRIDE),
        padding=((PAD, PAD), (PAD, PAD)),
        dimension_numbers=("NCHW", "OIHW", "NCHW"),
    ) + bias.reshape(1, C_OUT, 1, 1)
    ref = jnp.transpose(ref, (0, 2, 3, 1))

    assert y.shape == (N, H // 2, W // 2, C_OUT), y.shape
    assert jnp.allclose(y, ref, atol=1e-4, rtol=1e-4), \
        float(jnp.max(jnp.abs(y - ref)))

    print("KERNEL_OK")
</pallas_src>

<mosaic_0001>
module attributes {stable_mosaic.version = 11 : i64} {
  func.func @_conv_tile_kernel(%arg0: i32, %arg1: i32, %arg2: memref<1x36x9x4xf32, #tpu.memory_space<vmem>>, %arg3: memref<9x4x128xf32, #tpu.memory_space<vmem>>, %arg4: memref<1x128xf32, #tpu.memory_space<vmem>>, %arg5: memref<1x64x128xf32, #tpu.memory_space<vmem>>) attributes {dimension_semantics = [#tpu.dimension_semantics<parallel>, #tpu.dimension_semantics<parallel>], iteration_bounds = array<i64: 2, 1>, scalar_prefetch = 0 : i64, scratch_operands = 0 : i64, tpu.core_type = #tpu.core_type<tc>, window_params = [{transform_indices = @transform_0, window_bounds = array<i64: 1, 36, 9, 4>}, {pipeline_mode = #tpu.pipeline_mode<synchronous>, transform_indices = @transform_1, window_bounds = array<i64: 9, 4, 128>}, {pipeline_mode = #tpu.pipeline_mode<synchronous>, transform_indices = @transform_2, window_bounds = array<i64: 1, 128>}, {transform_indices = @transform_3, window_bounds = array<i64: 1, 64, 128>}]} {
    %c8_i32 = arith.constant 8 : i32
    %0 = arith.muli %arg1, %c8_i32 : i32
    %c0 = arith.constant 0 : index
    %c0_0 = arith.constant 0 : index
    %1 = vector.load %arg4[%c0, %c0_0] : memref<1x128xf32, #tpu.memory_space<vmem>>, vector<1x128xf32>
    %2 = vector.shape_cast %1 : vector<1x128xf32> to vector<1x128xf32>
    %3 = vector.broadcast %2 : vector<1x128xf32> to vector<64x128xf32>
    %c0_i32 = arith.constant 0 : i32
    %4 = arith.addi %c0_i32, %0 : i32
    %c0_1 = arith.constant 0 : index
    %5 = arith.index_cast %4 : i32 to index
    %c0_2 = arith.constant 0 : index
    %c0_3 = arith.constant 0 : index
    %6 = vector.load %arg2[%c0_1, %5, %c0_2, %c0_3] : memref<1x36x9x4xf32, #tpu.memory_space<vmem>>, vector<1x8x8x4xf32>
    %7 = vector.shape_cast %6 : vector<1x8x8x4xf32> to vector<8x8x4xf32>
    %8 = vector.shape_cast %7 : vector<8x8x4xf32> to vector<64x4xf32>
    %c0_4 = arith.constant 0 : index
    %c0_5 = arith.constant 0 : index
    %c0_6 = arith.constant 0 : index
    %9 = vector.load %arg3[%c0_4, %c0_5, %c0_6] : memref<9x4x128xf32, #tpu.memory_space<vmem>>, vector<1x4x128xf32>
    %10 = vector.shape_cast %9 : vector<1x4x128xf32> to vector<4x128xf32>
    %cst = arith.constant dense<0.000000e+00> : vector<64x128xf32>
    %11 = tpu.matmul %8, %10, %cst {dimension_numbers = #tpu.dot_dimension_numbers<[1], [0], [0], [1], [0, 0, 1, 1], [], []>} : vector<64x4xf32>, vector<4x128xf32>, vector<64x128xf32> -> vector<64x128xf32>
    %12 = arith.addf %3, %11 : vector<64x128xf32>
    %c9_i32 = arith.constant 9 : i32
    %13 = arith.addi %c9_i32, %0 : i32
    %c0_7 = arith.constant 0 : index
    %14 = arith.index_cast %13 : i32 to index
    %c0_8 = arith.constant 0 : index
    %c0_9 = arith.constant 0 : index
    %15 = vector.load %arg2[%c0_7, %14, %c0_8, %c0_9] : memref<1x36x9x4xf32, #tpu.memory_space<vmem>>, vector<1x8x8x4xf32>
    %16 = vector.shape_cast %15 : vector<1x8x8x4xf32> to vector<8x8x4xf32>
    %17 = vector.shape_cast %16 : vector<8x8x4xf32> to vector<64x4xf32>
    %c1 = arith.constant 1 : index
    %c0_10 = arith.constant 0 : index
    %c0_11 = arith.constant 0 : index
    %18 = vector.load %arg3[%c1, %c0_10, %c0_11] : memref<9x4x128xf32, #tpu.memory_space<vmem>>, vector<1x4x128xf32>
    %19 = vector.shape_cast %18 : vector<1x4x128xf32> to vector<4x128xf32>
    %cst_12 = arith.constant dense<0.000000e+00> : vector<64x128xf32>
    %20 = tpu.matmul %17, %19, %cst_12 {dimension_numbers = #tpu.dot_dimension_numbers<[1], [0], [0], [1], [0, 0, 1, 1], [], []>} : vector<64x4xf32>, vector<4x128xf32>, vector<64x128xf32> -> vector<64x128xf32>
    %21 = arith.addf %12, %20 : vector<64x128xf32>
    %c0_i32_13 = arith.constant 0 : i32
    %22 = arith.addi %c0_i32_13, %0 : i32
    %c0_14 = arith.constant 0 : index
    %23 = arith.index_cast %22 : i32 to index
    %c1_15 = arith.constant 1 : index
    %c0_16 = arith.constant 0 : index
    %24 = vector.load %arg2[%c0_14, %23, %c1_15, %c0_16] : memref<1x36x9x4xf32, #tpu.memory_space<vmem>>, vector<1x8x8x4xf32>
    %25 = vector.shape_cast %24 : vector<1x8x8x4xf32> to vector<8x8x4xf32>
    %26 = vector.shape_cast %25 : vector<8x8x4xf32> to vector<64x4xf32>
    %c2 = arith.constant 2 : index
    %c0_17 = arith.constant 0 : index
    %c0_18 = arith.constant 0 : index
    %27 = vector.load %arg3[%c2, %c0_17, %c0_18] : memref<9x4x128xf32, #tpu.memory_space<vmem>>, vector<1x4x128xf32>
    %28 = vector.shape_cast %27 : vector<1x4x128xf32> to vector<4x128xf32>
    %cst_19 = arith.constant dense<0.000000e+00> : vector<64x128xf32>
    %29 = tpu.matmul %26, %28, %cst_19 {dimension_numbers = #tpu.dot_dimension_numbers<[1], [0], [0], [1], [0, 0, 1, 1], [], []>} : vector<64x4xf32>, vector<4x128xf32>, vector<64x128xf32> -> vector<64x128xf32>
    %30 = arith.addf %21, %29 : vector<64x128xf32>
    %c18_i32 = arith.constant 18 : i32
    %31 = arith.addi %c18_i32, %0 : i32
    %c0_20 = arith.constant 0 : index
    %32 = arith.index_cast %31 : i32 to index
    %c0_21 = arith.constant 0 : index
    %c0_22 = arith.constant 0 : index
    %33 = vector.load %arg2[%c0_20, %32, %c0_21, %c0_22] : memref<1x36x9x4xf32, #tpu.memory_space<vmem>>, vector<1x8x8x4xf32>
    %34 = vector.shape_cast %33 : vector<1x8x8x4xf32> to vector<8x8x4xf32>
    %35 = vector.shape_cast %34 : vector<8x8x4xf32> to vector<64x4xf32>
    %c3 = arith.constant 3 : index
    %c0_23 = arith.constant 0 : index
    %c0_24 = arith.constant 0 : index
    %36 = vector.load %arg3[%c3, %c0_23, %c0_24] : memref<9x4x128xf32, #tpu.memory_space<vmem>>, vector<1x4x128xf32>
    %37 = vector.shape_cast %36 : vector<1x4x128xf32> to vector<4x128xf32>
    %cst_25 = arith.constant dense<0.000000e+00> : vector<64x128xf32>
    %38 = tpu.matmul %35, %37, %cst_25 {dimension_numbers = #tpu.dot_dimension_numbers<[1], [0], [0], [1], [0, 0, 1, 1], [], []>} : vector<64x4xf32>, vector<4x128xf32>, vector<64x128xf32> -> vector<64x128xf32>
    %39 = arith.addf %30, %38 : vector<64x128xf32>
    %c27_i32 = arith.constant 27 : i32
    %40 = arith.addi %c27_i32, %0 : i32
    %c0_26 = arith.constant 0 : index
    %41 = arith.index_cast %40 : i32 to index
    %c0_27 = arith.constant 0 : index
    %c0_28 = arith.constant 0 : index
    %42 = vector.load %arg2[%c0_26, %41, %c0_27, %c0_28] : memref<1x36x9x4xf32, #tpu.memory_space<vmem>>, vector<1x8x8x4xf32>
    %43 = vector.shape_cast %42 : vector<1x8x8x4xf32> to vector<8x8x4xf32>
    %44 = vector.shape_cast %43 : vector<8x8x4xf32> to vector<64x4xf32>
    %c4 = arith.constant 4 : index
    %c0_29 = arith.constant 0 : index
    %c0_30 = arith.constant 0 : index
    %45 = vector.load %arg3[%c4, %c0_29, %c0_30] : memref<9x4x128xf32, #tpu.memory_space<vmem>>, vector<1x4x128xf32>
    %46 = vector.shape_cast %45 : vector<1x4x128xf32> to vector<4x128xf32>
    %cst_31 = arith.constant dense<0.000000e+00> : vector<64x128xf32>
    %47 = tpu.matmul %44, %46, %cst_31 {dimension_numbers = #tpu.dot_dimension_numbers<[1], [0], [0], [1], [0, 0, 1, 1], [], []>} : vector<64x4xf32>, vector<4x128xf32>, vector<64x128xf32> -> vector<64x128xf32>
    %48 = arith.addf %39, %47 : vector<64x128xf32>
    %c18_i32_32 = arith.constant 18 : i32
    %49 = arith.addi %c18_i32_32, %0 : i32
    %c0_33 = arith.constant 0 : index
    %50 = arith.index_cast %49 : i32 to index
    %c1_34 = arith.constant 1 : index
    %c0_35 = arith.constant 0 : index
    %51 = vector.load %arg2[%c0_33, %50, %c1_34, %c0_35] : memref<1x36x9x4xf32, #tpu.memory_space<vmem>>, vector<1x8x8x4xf32>
    %52 = vector.shape_cast %51 : vector<1x8x8x4xf32> to vector<8x8x4xf32>
    %53 = vector.shape_cast %52 : vector<8x8x4xf32> to vector<64x4xf32>
    %c5 = arith.constant 5 : index
    %c0_36 = arith.constant 0 : index
    %c0_37 = arith.constant 0 : index
    %54 = vector.load %arg3[%c5, %c0_36, %c0_37] : memref<9x4x128xf32, #tpu.memory_space<vmem>>, vector<1x4x128xf32>
    %55 = vector.shape_cast %54 : vector<1x4x128xf32> to vector<4x128xf32>
    %cst_38 = arith.constant dense<0.000000e+00> : vector<64x128xf32>
    %56 = tpu.matmul %53, %55, %cst_38 {dimension_numbers = #tpu.dot_dimension_numbers<[1], [0], [0], [1], [0, 0, 1, 1], [], []>} : vector<64x4xf32>, vector<4x128xf32>, vector<64x128xf32> -> vector<64x128xf32>
    %57 = arith.addf %48, %56 : vector<64x128xf32>
    %c1_i32 = arith.constant 1 : i32
    %58 = arith.addi %c1_i32, %0 : i32
    %c0_39 = arith.constant 0 : index
    %59 = arith.index_cast %58 : i32 to index
    %c0_40 = arith.constant 0 : index
    %c0_41 = arith.constant 0 : index
    %60 = vector.load %arg2[%c0_39, %59, %c0_40, %c0_41] : memref<1x36x9x4xf32, #tpu.memory_space<vmem>>, vector<1x8x8x4xf32>
    %61 = vector.shape_cast %60 : vector<1x8x8x4xf32> to vector<8x8x4xf32>
    %62 = vector.shape_cast %61 : vector<8x8x4xf32> to vector<64x4xf32>
    %c6 = arith.constant 6 : index
    %c0_42 = arith.constant 0 : index
    %c0_43 = arith.constant 0 : index
    %63 = vector.load %arg3[%c6, %c0_42, %c0_43] : memref<9x4x128xf32, #tpu.memory_space<vmem>>, vector<1x4x128xf32>
    %64 = vector.shape_cast %63 : vector<1x4x128xf32> to vector<4x128xf32>
    %cst_44 = arith.constant dense<0.000000e+00> : vector<64x128xf32>
    %65 = tpu.matmul %62, %64, %cst_44 {dimension_numbers = #tpu.dot_dimension_numbers<[1], [0], [0], [1], [0, 0, 1, 1], [], []>} : vector<64x4xf32>, vector<4x128xf32>, vector<64x128xf32> -> vector<64x128xf32>
    %66 = arith.addf %57, %65 : vector<64x128xf32>
    %c10_i32 = arith.constant 10 : i32
    %67 = arith.addi %c10_i32, %0 : i32
    %c0_45 = arith.constant 0 : index
    %68 = arith.index_cast %67 : i32 to index
    %c0_46 = arith.constant 0 : index
    %c0_47 = arith.constant 0 : index
    %69 = vector.load %arg2[%c0_45, %68, %c0_46, %c0_47] : memref<1x36x9x4xf32, #tpu.memory_space<vmem>>, vector<1x8x8x4xf32>
    %70 = vector.shape_cast %69 : vector<1x8x8x4xf32> to vector<8x8x4xf32>
    %71 = vector.shape_cast %70 : vector<8x8x4xf32> to vector<64x4xf32>
    %c7 = arith.constant 7 : index
    %c0_48 = arith.constant 0 : index
    %c0_49 = arith.constant 0 : index
    %72 = vector.load %arg3[%c7, %c0_48, %c0_49] : memref<9x4x128xf32, #tpu.memory_space<vmem>>, vector<1x4x128xf32>
    %73 = vector.shape_cast %72 : vector<1x4x128xf32> to vector<4x128xf32>
    %cst_50 = arith.constant dense<0.000000e+00> : vector<64x128xf32>
    %74 = tpu.matmul %71, %73, %cst_50 {dimension_numbers = #tpu.dot_dimension_numbers<[1], [0], [0], [1], [0, 0, 1, 1], [], []>} : vector<64x4xf32>, vector<4x128xf32>, vector<64x128xf32> -> vector<64x128xf32>
    %75 = arith.addf %66, %74 : vector<64x128xf32>
    %c1_i32_51 = arith.constant 1 : i32
    %76 = arith.addi %c1_i32_51, %0 : i32
    %c0_52 = arith.constant 0 : index
    %77 = arith.index_cast %76 : i32 to index
    %c1_53 = arith.constant 1 : index
    %c0_54 = arith.constant 0 : index
    %78 = vector.load %arg2[%c0_52, %77, %c1_53, %c0_54] : memref<1x36x9x4xf32, #tpu.memory_space<vmem>>, vector<1x8x8x4xf32>
    %79 = vector.shape_cast %78 : vector<1x8x8x4xf32> to vector<8x8x4xf32>
    %80 = vector.shape_cast %79 : vector<8x8x4xf32> to vector<64x4xf32>
    %c8 = arith.constant 8 : index
    %c0_55 = arith.constant 0 : index
    %c0_56 = arith.constant 0 : index
    %81 = vector.load %arg3[%c8, %c0_55, %c0_56] : memref<9x4x128xf32, #tpu.memory_space<vmem>>, vector<1x4x128xf32>
    %82 = vector.shape_cast %81 : vector<1x4x128xf32> to vector<4x128xf32>
    %cst_57 = arith.constant dense<0.000000e+00> : vector<64x128xf32>
    %83 = tpu.matmul %80, %82, %cst_57 {dimension_numbers = #tpu.dot_dimension_numbers<[1], [0], [0], [1], [0, 0, 1, 1], [], []>} : vector<64x4xf32>, vector<4x128xf32>, vector<64x128xf32> -> vector<64x128xf32>
    %84 = arith.addf %75, %83 : vector<64x128xf32>
    %c0_58 = arith.constant 0 : index
    %c0_59 = arith.constant 0 : index
    %c0_60 = arith.constant 0 : index
    %85 = vector.load %arg5[%c0_58, %c0_59, %c0_60] : memref<1x64x128xf32, #tpu.memory_space<vmem>>, vector<1x64x128xf32>
    %86 = vector.shape_cast %85 : vector<1x64x128xf32> to vector<64x128xf32>
    %87 = vector.shape_cast %84 : vector<64x128xf32> to vector<1x64x128xf32>
    tpu.vector_store %arg5[%c0_58, %c0_59, %c0_60], %87 {strides = array<i32>} : memref<1x64x128xf32, #tpu.memory_space<vmem>>, vector<1x64x128xf32>,
    return
  }
  func.func @transform_0(%arg0: i32, %arg1: i32) -> (i32, i32, i32, i32) {
    %c0_i32 = arith.constant 0 : i32
    %c0_i32_0 = arith.constant 0 : i32
    %c0_i32_1 = arith.constant 0 : i32
    %c0_i32_2 = arith.constant 0 : i32
    return %arg0, %c0_i32, %c0_i32_0, %c0_i32_1 : i32, i32, i32, i32
  }
  func.func @transform_1(%arg0: i32, %arg1: i32) -> (i32, i32, i32) {
    %c0_i32 = arith.constant 0 : i32
    %c0_i32_0 = arith.constant 0 : i32
    %c0_i32_1 = arith.constant 0 : i32
    %c0_i32_2 = arith.constant 0 : i32
    return %c0_i32, %c0_i32_0, %c0_i32_1 : i32, i32, i32
  }
  func.func @transform_2(%arg0: i32, %arg1: i32) -> (i32, i32) {
    %c0_i32 = arith.constant 0 : i32
    %c0_i32_0 = arith.constant 0 : i32
    %c0_i32_1 = arith.constant 0 : i32
    return %c0_i32, %c0_i32_0 : i32, i32
  }
  func.func @transform_3(%arg0: i32, %arg1: i32) -> (i32, i32, i32) {
    %c0_i32 = arith.constant 0 : i32
    %c0_i32_0 = arith.constant 0 : i32
    return %arg0, %arg1, %c0_i32 : i32, i32, i32
  }
}

</mosaic_0001>

<bundles_post_ra>
// kernel: tpu_custom_call.1
= control target key start
LH: loop header
LB: loop body
LE: loop exit
PB: predicated region body
PF: predicated region fallthrough
CT: control target
= control target key end

     0   :  { %8 = vsyncpa [#allocation3], 0  ;;  %s2591_s0 = inlined_call_operand.vmem [shape: f32[2,36,9,4], index: 0, kind: input, shape index: {}]   ;;  %s2592_s1 = inlined_call_operand.vmem [shape: f32[9,4,128], index: 1, kind: input, shape index: {}]   ;;  %s2593_s2 = inlined_call_operand.vmem [shape: f32[1,128], index: 2, kind: input, shape index: {}]   ;;  %s2594_s3 = inlined_call_operand.hbm [shape: f32[2,64,128], index: 3, kind: output, shape index: {}]  }
   0x1   :  { %10 = vsyncpa [#allocation3 + $0x1], 0  ;;  %s2280_s12 = smov 0   ;;  %s2282_s13 = smov 0  }
   0x2   :  { %s2284_s14 = smov 0   ;;  %s2286_s15 = smov 0  }
   0x3   :  { %s2288_s16 = smov 0   ;;  %s2290_s17 = smov 0  }
   0x4 LB: > { %s1679_s18 = sadd.s32 4294967295, %s2255_s17   ;;  %s1680_s19 = sadd.s32 4294967294, %s2255_s17   ;;  %s2255_s17 = sphi %s2290_s17, %s16_s17   ;;  %s2251_s16 = sphi %s2288_s16, %s2601_s16   ;;  %s2247_s15 = sphi %s2286_s15, %s2600_s15   ;;  %s2243_s14 = sphi %s2284_s14, %s2599_s14   ;;  %s2239_s13 = sphi %s2282_s13, %s2598_s13   ;;  %s2235_s12 = sphi %s2280_s12, %s2597_s12  }
   0x5   : > { %s28_s20 = sadd.s32 1, %s2251_s16  ;;  %s105_s21 = sadd.s32 1, %s2243_s14 }
   0x6   : > { %p30_p0 = scmp.ge.s32.totalorder %s28_s20, 2  ;;  %p115_p1 = scmp.ne.s32.totalorder %s2243_s14, %s2239_s13 }
   0x7   : > { %p116_p2 = scmp.eq.s32.totalorder %s1679_s18, 1  ;;  %p121_p3 = scmp.ne.s32.totalorder %s2239_s13, %s2235_s12 }
   0x8   : > { %s2603_s20 = smov (%p30_p0, %s28_s20), 0  ;;  %p122_p5 = scmp.eq.s32.totalorder %s1680_s19, 1 }
   0x9   : > { %p2320_p4 = por %p116_p2, %p115_p1  ;;  %s100_s23 = ssub.s32 %s2251_s16, %s2603_s20 }
   0xa   : > { %p1683_p6 = scmp.ge.s32.totalorder %s2255_s17, 1  ;;  %p103_p7 = scmp.eq.s32.totalorder %s100_s23, 0 }
   0xb   : > { %p2327_p8 = por %p122_p5, %p121_p3  ;;  %p154_p9 = scmp.lt.s32.totalorder %s2255_s17, 3 }
   0xc   : > { %s2333_s25 = scalar_select %p103_p7, %s2243_s14, %s105_s21  }
   0xd   : > { %p155_p10 = pnand %p1683_p6, %p154_p9 }
   0xe   : > { %v202_v0 = vld [vmem:[%s2592_s1] sm:$0xf] (!%p155_p10)  ;;  %vm228_vm0 = vcmask (!%p155_p10), 1043456   ;;  %v2341_v1 = vld [vmem:[%s2592_s1 + $0x10] sm:$0xf] (!%p155_p10)  ;;  %p178_p11 = scmp.lt.s32.totalorder (!%p155_p10), %s2247_s15, 1 }
   0xf   : > { %158 = sbr.rel (%p155_p10) target bundleno = 329 (0x149), region = 32  ;;  %1919 = vmatprep.subr.msk.mxu1 (!%p155_p10), %vm228_vm0, %v202_v0  ;;  %1975 = vmatprep.subr.msk.mxu0 (!%p155_p10), %vm228_vm0, %v2341_v1  ;;  %v1704_v2 = vld [vmem:[%s2592_s1 + $0x4] sm:$0xf] (!%p155_p10)  ;;  %v1768_v3 = vld [vmem:[%s2592_s1 + $0x14] sm:$0xf] (!%p155_p10)  ;;  %vm203_vm1 = vcmask (!%p155_p10), 31744  }
  0x10   : > { %1920 = vmatpush3.msk.msra.mxu1 (!%p155_p10), %vm228_vm0, %v202_v0  ;;  %1976 = vmatpush3.msk.msra.mxu0 (!%p155_p10), %vm228_vm0, %v2341_v1  ;;  %v1786_v10 = vld [vmem:[%s2592_s1 + $0x18] sm:$0xf] (!%p155_p10)  ;;  %v1714_v11 = vld [vmem:[%s2592_s1 + $0x8] sm:$0xf] (!%p155_p10)  ;;  %v1804_v20 = vld [vmem:[%s2592_s1 + $0x1c] sm:$0xf] (!%p155_p10) }
  0x11   : > { %1933 = vmatprep.subr.msk.mxu1 (!%p155_p10), %vm228_vm0, %v1704_v2  ;;  %1989 = vmatprep.subr.msk.mxu0 (!%p155_p10), %vm228_vm0, %v1768_v3  ;;  %v1732_v29 = vld [vmem:[%s2592_s1 + $0xc] sm:$0xf] (!%p155_p10)  ;;  %v1822_v35 = vld [vmem:[%s2592_s1 + $0x20] sm:$0xf] (!%p155_p10)  ;;  %s175_s5 = sand.u32 (!%p155_p10), 1, %s2239_s13   ;;  %s1837_s10 = sshll.u32 (!%p155_p10), %s2247_s15, 10 }
  0x12   : > { %v1686_v62 = vld [vmem:[%s2593_s2] ss:$0 sm:$0xff] (!%p155_p10)  ;;  %s2537_s21 = scalar_lea.hbm (!%p155_p10), %s2594_s3, %s1837_s10  ;;  %s2257_s26 = smov (!%p155_p10), [#allocation2]  }
  0x13   : > { %s2181_s27 = sshll.u32 (!%p155_p10), %s2257_s26, 4  ;;  %s2182_s27 = int_to_ptr.vmem [resolvable:$false] %s2181_s27 }
  0x14   : > { %s2183_s28 = scalar_lea.vmem (!%p155_p10), %s2182_s27, 2048 }
  0x16   : > { %s179_s7 = scalar_select %p178_p11, %s2247_s15, 1 }
  0x17   : > { %s2545_s15 = scalar_lea.sflag [#allocation3], %s175_s5 }
  0x18   : > { %s2119_s8 = smul.u32 576, %s179_s7 }
  0x1a   : > { %s2362_s11 = scalar_lea.vmem %s2591_s0, %s2119_s8  ;;  %s1684_s8 = sshll.u32 %s175_s5, 6 }
  0x1b   : > { %v194_v4 = vld [vmem:[%s2362_s11] sm:$0xff]  ;;  %v1742_v5 = vld [vmem:[%s2362_s11 + $0x1b0] sm:$0xff]  ;;  %s2524_s9 = scalar_lea.vmem [#allocation2], %s1684_s8 }
  0x1c   : > { %v195_v6 = vld [vmem:[%s2362_s11 + $0x10] sm:$0xff]  ;;  %1921 = vmatprep.mubr.msk.f32.mxu1 %vm203_vm1, %v194_v4  ;;  %1977 = vmatprep.mubr.msk.f32.mxu0 %vm203_vm1, %v1742_v5  ;;  %v1743_v7 = vld [vmem:[%s2362_s11 + $0x1c0] sm:$0xff] }
  0x1d   : > { %v196_v8 = vld [vmem:[%s2362_s11 + $0x20] sm:$0xff]  ;;  %v1744_v9 = vld [vmem:[%s2362_s11 + $0x1d0] sm:$0xff]  ;;  %1922 = vmatmul.mubr.msk.f32.vlgmr.msra.gmra.mrb[0].mxu1 %vm203_vm1, %v195_v6  ;;  %1978 = vmatmul.mubr.msk.f32.vlgmr.msra.gmra.mrb[0].mxu0 %vm203_vm1, %v1743_v7 }
  0x1e   : > { %1934 = vmatpush3.msk.msra.mxu1 %vm228_vm0, %v1704_v2  ;;  %1990 = vmatpush3.msk.msra.mxu0 %vm228_vm0, %v1768_v3  ;;  %v197_v12 = vld [vmem:[%s2362_s11 + $0x30] sm:$0xff]  ;;  %v1745_v13 = vld [vmem:[%s2362_s11 + $0x1e0] sm:$0xff] }
  0x1f   : > { %1924 = vmatprep.mubr.msk.f32.mxu1 %vm203_vm1, %v196_v8  ;;  %1980 = vmatprep.mubr.msk.f32.mxu0 %vm203_vm1, %v1744_v9  ;;  %v198_v14 = vld [vmem:[%s2362_s11 + $0x40] sm:$0xff]  ;;  %v199_v16 = vld [vmem:[%s2362_s11 + $0x50] sm:$0xff] }
  0x20   : > { %v1760_v15 = vld [vmem:[%s2362_s11 + $0x121] sm:$0xff]  ;;  %2003 = vmatprep.subr.msk.mxu0 %vm228_vm0, %v1786_v10  ;;  %1947 = vmatprep.subr.msk.mxu1 %vm228_vm0, %v1714_v11  ;;  %v1761_v17 = vld [vmem:[%s2362_s11 + $0x131] sm:$0xff] }
  0x21   : > { %1925 = vmatmul.mubr.msk.f32.gmra.mrb[2].mxu1 %vm203_vm1, %v197_v12  ;;  %1981 = vmatmul.mubr.msk.f32.gmra.mrb[2].mxu0 %vm203_vm1, %v1745_v13  ;;  %v200_v18 = vld [vmem:[%s2362_s11 + $0x60] sm:$0xff]  ;;  %v201_v21 = vld [vmem:[%s2362_s11 + $0x70] sm:$0xff] }
  0x22   : > { %1927 = vmatprep.mubr.msk.f32.mxu1 %vm203_vm1, %v198_v14  ;;  %1991 = vmatprep.mubr.msk.f32.mxu0 %vm203_vm1, %v1760_v15  ;;  %v1762_v19 = vld [vmem:[%s2362_s11 + $0x141] sm:$0xff]  ;;  %v1763_v22 = vld [vmem:[%s2362_s11 + $0x151] sm:$0xff] }
  0x23   : > { %v1696_v23 = vld [vmem:[%s2362_s11 + $0x90] sm:$0xff]  ;;  %v1764_v24 = vld [vmem:[%s2362_s11 + $0x161] sm:$0xff] }
  0x24   : > { %v1697_v25 = vld [vmem:[%s2362_s11 + $0xa0] sm:$0xff]  ;;  %v1765_v26 = vld [vmem:[%s2362_s11 + $0x171] sm:$0xff] }
  0x25   : > { %1928 = vmatmul.mubr.msk.f32.gmra.mrb[4].mxu1 %vm203_vm1, %v199_v16  ;;  %1992 = vmatmul.mubr.msk.f32.vlgmr.msra.gmra.mrb[0].mxu0 %vm203_vm1, %v1761_v17  ;;  %v1698_v27 = vld [vmem:[%s2362_s11 + $0xb0] sm:$0xff]  ;;  %v1766_v28 = vld [vmem:[%s2362_s11 + $0x181] sm:$0xff] }
  0x26   : > { %2004 = vmatpush3.msk.msra.mxu0 %vm228_vm0, %v1786_v10  ;;  %1930 = vmatprep.mubr.msk.f32.mxu1 %vm203_vm1, %v200_v18  ;;  %v1699_v30 = vld [vmem:[%s2362_s11 + $0xc0] sm:$0xff]  ;;  %v1767_v31 = vld [vmem:[%s2362_s11 + $0x191] sm:$0xff] }
  0x27   : > { %1994 = vmatprep.mubr.msk.f32.mxu0 %vm203_vm1, %v1762_v19  ;;  %2017 = vmatprep.subr.msk.mxu0 %vm228_vm0, %v1804_v20  ;;  %v1700_v32 = vld [vmem:[%s2362_s11 + $0xd0] sm:$0xff]  ;;  %v1701_v33 = vld [vmem:[%s2362_s11 + $0xe0] sm:$0xff] }
  0x28   : > { %v1702_v34 = vld [vmem:[%s2362_s11 + $0xf0] sm:$0xff]  ;;  %v1703_v36 = vld [vmem:[%s2362_s11 + $0x100] sm:$0xff] }
  0x29   : > { %1931 = vmatmul.mubr.msk.f32.gmra.mrb[6].mxu1 %vm203_vm1, %v201_v21  ;;  %1995 = vmatmul.mubr.msk.f32.gmra.mrb[2].mxu0 %vm203_vm1, %v1763_v22  ;;  %v498_v37 = vld [vmem:[%s2362_s11 + $0x1] sm:$0xff]  ;;  %v499_v38 = vld [vmem:[%s2362_s11 + $0x11] sm:$0xff] }
  0x2a   : > { %1935 = vmatprep.mubr.msk.f32.mxu1 %vm203_vm1, %v1696_v23  ;;  %1997 = vmatprep.mubr.msk.f32.mxu0 %vm203_vm1, %v1764_v24  ;;  %v500_v39 = vld [vmem:[%s2362_s11 + $0x21] sm:$0xff]  ;;  %v501_v40 = vld [vmem:[%s2362_s11 + $0x31] sm:$0xff] }
  0x2b   : > { %v1785_v41 = vld [vmem:[%s2362_s11 + $0x80] sm:$0xff]  ;;  %v503_v43 = vld [vmem:[%s2362_s11 + $0x51] sm:$0xff] }
  0x2c   : > { %v502_v42 = vld [vmem:[%s2362_s11 + $0x41] sm:$0xff]  ;;  %v505_v45 = vld [vmem:[%s2362_s11 + $0x71] sm:$0xff] }
  0x2d   : > { %1936 = vmatmul.mubr.msk.f32.vlgmr.msra.gmra.mrb[0].mxu1 %vm203_vm1, %v1697_v25  ;;  %1998 = vmatmul.mubr.msk.f32.gmra.mrb[4].mxu0 %vm203_vm1, %v1765_v26  ;;  %v504_v44 = vld [vmem:[%s2362_s11 + $0x61] sm:$0xff]  ;;  %v1725_v47 = vld [vmem:[%s2362_s11 + $0x130] sm:$0xff] }
  0x2e   : > { %1948 = vmatpush3.msk.msra.mxu1 %vm228_vm0, %v1714_v11  ;;  %1938 = vmatprep.mubr.msk.f32.mxu1 %vm203_vm1, %v1698_v27  ;;  %v1724_v46 = vld [vmem:[%s2362_s11 + $0x120] sm:$0xff]  ;;  %v1727_v49 = vld [vmem:[%s2362_s11 + $0x150] sm:$0xff] }
  0x2f   : > { %2000 = vmatprep.mubr.msk.f32.mxu0 %vm203_vm1, %v1766_v28  ;;  %1961 = vmatprep.subr.msk.mxu1 %vm228_vm0, %v1732_v29  ;;  %v1726_v48 = vld [vmem:[%s2362_s11 + $0x140] sm:$0xff]  ;;  %v1803_v50 = vld [vmem:[%s2362_s11 + $0x110] sm:$0xff] }
  0x30   : > { %v1728_v51 = vld [vmem:[%s2362_s11 + $0x160] sm:$0xff]  ;;  %v1729_v52 = vld [vmem:[%s2362_s11 + $0x170] sm:$0xff] }
  0x31   : > { %1939 = vmatmul.mubr.msk.f32.gmra.mrb[2].mxu1 %vm203_vm1, %v1699_v30  ;;  %2001 = vmatmul.mubr.msk.f32.gmra.mrb[6].mxu0 %vm203_vm1, %v1767_v31  ;;  %v1730_v53 = vld [vmem:[%s2362_s11 + $0x180] sm:$0xff]  ;;  %v1731_v54 = vld [vmem:[%s2362_s11 + $0x190] sm:$0xff] }
  0x32   : > { %1941 = vmatprep.mubr.msk.f32.mxu1 %vm203_vm1, %v1700_v32  ;;  %2005 = vmatprep.mubr.msk.f32.mxu0 %vm203_vm1, %v195_v6  ;;  %v1746_v55 = vld [vmem:[%s2362_s11 + $0x1f0] sm:$0xff]  ;;  %v1747_v56 = vld [vmem:[%s2362_s11 + $0x200] sm:$0xff] }
  0x33   : > { %v1748_v57 = vld [vmem:[%s2362_s11 + $0x210] sm:$0xff]  ;;  %v1749_v58 = vld [vmem:[%s2362_s11 + $0x220] sm:$0xff] }
  0x34   : > { %v1821_v59 = vld [vmem:[%s2362_s11 + $0x81] sm:$0xff]  ;;  %s1584_s11 = sshll.u32 %s2524_s9, 4  ;;  %s2539_s11 = int_to_ptr.vmem [resolvable:$true] %s1584_s11 }
  0x35   : > { %1942 = vmatmul.mubr.msk.f32.gmra.mrb[4].mxu1 %vm203_vm1, %v1701_v33  ;;  %2006 = vmatmul.mubr.msk.f32.vlgmr.msra.gmra.mrb[0].mxu0 %vm203_vm1, %v196_v8  ;;  %s2177_s23 = scalar_lea.vmem %s2539_s11, 1024  ;;  %p2184_p1 = scmp.lt.s32.totalorder %s2539_s11, %s2182_s27 }
  0x36   : > { %2018 = vmatpush3.msk.msra.mxu0 %vm228_vm0, %v1804_v20  ;;  %1944 = vmatprep.mubr.msk.f32.mxu1 %vm203_vm1, %v1702_v34  ;;  %p2178_p12 = scmp.ne.s32.totalorder %s2539_s11, %s2177_s23  ;;  %p2185_p2 = scmp.lt.s32.totalorder %s2183_s28, %s2177_s23 }
  0x37   : > { %2008 = vmatprep.mubr.msk.f32.mxu0 %vm203_vm1, %v197_v12  ;;  %2031 = vmatprep.subr.msk.mxu0 %vm228_vm0, %v1822_v35 }
  0x38   : > { %p2179_p13 = pnand %p2178_p12, %p2320_p4  ;;  %p2186_p3 = por %p2185_p2, %p2184_p1 }
  0x39   : > { %1945 = vmatmul.mubr.msk.f32.gmra.mrb[6].mxu1 %vm203_vm1, %v1703_v36  ;;  %2009 = vmatmul.mubr.msk.f32.gmra.mrb[2].mxu0 %vm203_vm1, %v198_v14 }
  0x3a   : > { %1949 = vmatprep.mubr.msk.f32.mxu1 %vm203_vm1, %v498_v37  ;;  %2011 = vmatprep.mubr.msk.f32.mxu0 %vm203_vm1, %v199_v16  ;;  %p2180_p0 = pneg %p2179_p13 }
  0x3c   : > { %p2187_p5 = pnand %p2186_p3, %p2180_p0 }
  0x3d   : > { %1950 = vmatmul.mubr.msk.f32.vlgmr.msra.gmra.mrb[0].mxu1 %vm203_vm1, %v499_v38  ;;  %2012 = vmatmul.mubr.msk.f32.gmra.mrb[4].mxu0 %vm203_vm1, %v200_v18 }
  0x3e   : > { %1962 = vmatpush3.msk.msra.mxu1 %vm228_vm0, %v1732_v29  ;;  %1952 = vmatprep.mubr.msk.f32.mxu1 %vm203_vm1, %v500_v39 }
  0x3f   : > { %2014 = vmatprep.mubr.msk.f32.mxu0 %vm203_vm1, %v201_v21  ;;  %2045 = vmatprep.subr.msk.mxu1 %vm228_vm0, %v2341_v1 }
  0x41   : > { %1953 = vmatmul.mubr.msk.f32.gmra.mrb[2].mxu1 %vm203_vm1, %v501_v40  ;;  %2015 = vmatmul.mubr.msk.f32.gmra.mrb[6].mxu0 %vm203_vm1, %v1785_v41 }
  0x42   : > { %1955 = vmatprep.mubr.msk.f32.mxu1 %vm203_vm1, %v502_v42  ;;  %2019 = vmatprep.mubr.msk.f32.mxu0 %vm203_vm1, %v1697_v25 }
  0x45   : > { %1956 = vmatmul.mubr.msk.f32.gmra.mrb[4].mxu1 %vm203_vm1, %v503_v43  ;;  %2020 = vmatmul.mubr.msk.f32.vlgmr.msra.gmra.mrb[0].mxu0 %vm203_vm1, %v1698_v27 }
  0x46   : > { %2032 = vmatpush3.msk.msra.mxu0 %vm228_vm0, %v1822_v35  ;;  %1958 = vmatprep.mubr.msk.f32.mxu1 %vm203_vm1, %v504_v44 }
  0x47   : > { %2022 = vmatprep.mubr.msk.f32.mxu0 %vm203_vm1, %v1699_v30 }
  0x49   : > { %1959 = vmatmul.mubr.msk.f32.gmra.mrb[6].mxu1 %vm203_vm1, %v505_v45  ;;  %2023 = vmatmul.mubr.msk.f32.gmra.mrb[2].mxu0 %vm203_vm1, %v1700_v32 }
  0x4a   : > { %1963 = vmatprep.mubr.msk.f32.mxu1 %vm203_vm1, %v1724_v46  ;;  %2025 = vmatprep.mubr.msk.f32.mxu0 %vm203_vm1, %v1701_v33 }
  0x4d   : > { %1964 = vmatmul.mubr.msk.f32.vlgmr.msra.gmra.mrb[0].mxu1 %vm203_vm1, %v1725_v47  ;;  %2026 = vmatmul.mubr.msk.f32.gmra.mrb[4].mxu0 %vm203_vm1, %v1702_v34 }
  0x4e   : > { %2046 = vmatpush3.msk.msra.mxu1 %vm228_vm0, %v2341_v1  ;;  %1966 = vmatprep.mubr.msk.f32.mxu1 %vm203_vm1, %v1726_v48 }
  0x4f   : > { %2028 = vmatprep.mubr.msk.f32.mxu0 %vm203_vm1, %v1703_v36 }
  0x51   : > { %1967 = vmatmul.mubr.msk.f32.gmra.mrb[2].mxu1 %vm203_vm1, %v1727_v49  ;;  %2029 = vmatmul.mubr.msk.f32.gmra.mrb[6].mxu0 %vm203_vm1, %v1803_v50 }
  0x52   : > { %1969 = vmatprep.mubr.msk.f32.mxu1 %vm203_vm1, %v1728_v51  ;;  %2033 = vmatprep.mubr.msk.f32.mxu0 %vm203_vm1, %v499_v38 }
  0x55   : > { %1970 = vmatmul.mubr.msk.f32.gmra.mrb[4].mxu1 %vm203_vm1, %v1729_v52  ;;  %2034 = vmatmul.mubr.msk.f32.vlgmr.msra.gmra.mrb[0].mxu0 %vm203_vm1, %v500_v39 }
  0x56   : > { %1972 = vmatprep.mubr.msk.f32.mxu1 %vm203_vm1, %v1730_v53  ;;  %2036 = vmatprep.mubr.msk.f32.mxu0 %vm203_vm1, %v501_v40 }
  0x59   : > { %1973 = vmatmul.mubr.msk.f32.gmra.mrb[6].mxu1 %vm203_vm1, %v1731_v54  ;;  %2037 = vmatmul.mubr.msk.f32.gmra.mrb[2].mxu0 %vm203_vm1, %v502_v42 }
  0x5a   : > { %1983 = vmatprep.mubr.msk.f32.mxu1 %vm203_vm1, %v1746_v55  ;;  %2039 = vmatprep.mubr.msk.f32.mxu0 %vm203_vm1, %v503_v43 }
  0x5d   : > { %1984 = vmatmul.mubr.msk.f32.vlgmr.msra.gmra.mrb[4].mxu1 %vm203_vm1, %v1747_v56  ;;  %2040 = vmatmul.mubr.msk.f32.gmra.mrb[4].mxu0 %vm203_vm1, %v504_v44 }
  0x5e   : > { %1986 = vmatprep.mubr.msk.f32.mxu1 %vm203_vm1, %v1748_v57  ;;  %2042 = vmatprep.mubr.msk.f32.mxu0 %vm203_vm1, %v505_v45 }
  0x61   : > { %1987 = vmatmul.mubr.msk.f32.gmra.mrb[6].mxu1 %vm203_vm1, %v1749_v58  ;;  %2043 = vmatmul.mubr.msk.f32.gmra.mrb[6].mxu0 %vm203_vm1, %v1821_v59 }
 0x120   : > { %v1965_v60 = vpop.f32.mrb[0].mxu1 }
 0x121   : > { %v754_v61 = vpop.f32.mrb[1].mxu1  ;;  %v2047_v1 = vadd.f32 %v1965_v60, %v1686_v62 }
 0x122   : > { %v2049_v2 = vadd.f32 %v1686_v62, %v754_v61 }
 0x124   : > { %v1968_v63 = vpop.f32.mrb[2].mxu1 }
 0x125   : > { %v764_v0 = vpop.f32.mrb[3].mxu1  ;;  %v2051_v7 = vadd.f32 %v1968_v63, %v1686_v62 }
 0x126   : > { %v2053_v8 = vadd.f32 %v1686_v62, %v764_v0 }
 0x128   : > { %v2035_v3 = vpop.f32.mrb[0].mxu0 }
 0x129   : > { %v2048_v4 = vadd.f32 %v2047_v1, %v2035_v3  ;;  %v1513_v5 = vpop.f32.mrb[1].mxu0 }
 0x12a   : > { %v2050_v6 = vadd.f32 %v2049_v2, %v1513_v5 }
 0x12b   : > { %1561 = vst [vmem:[%s2524_s9 + $0x8] sm:$0xff] %v2048_v4 }
 0x12c   : > { %1560 = vst [vmem:[%s2524_s9] sm:$0xff] %v2050_v6  ;;  %v2038_v9 = vpop.f32.mrb[2].mxu0 }
 0x12d   : > { %v2052_v10 = vadd.f32 %v2051_v7, %v2038_v9  ;;  %v1523_v11 = vpop.f32.mrb[3].mxu0 }
 0x12e   : > { %v2054_v12 = vadd.f32 %v2053_v8, %v1523_v11 }
 0x12f   : > { %1563 = vst [vmem:[%s2524_s9 + $0x18] sm:$0xff] %v2052_v10 }
 0x130   : > { %1562 = vst [vmem:[%s2524_s9 + $0x10] sm:$0xff] %v2054_v12  ;;  %v1985_v13 = vpop.f32.mrb[4].mxu1  ;;  %v2041_v14 = vpop.f32.mrb[4].mxu0 }
 0x131   : > { %v2055_v15 = vadd.f32 %v1985_v13, %v1686_v62  ;;  %v927_v16 = vpop.f32.mrb[5].mxu1  ;;  %v1533_v17 = vpop.f32.mrb[5].mxu0 }
 0x132   : > { %v2057_v18 = vadd.f32 %v1686_v62, %v927_v16 }
 0x133   : > { %v2056_v19 = vadd.f32 %v2055_v15, %v2041_v14 }
 0x134   : > { %v2058_v20 = vadd.f32 %v2057_v18, %v1533_v17  ;;  %v1988_v21 = vpop.f32.mrb[6].mxu1  ;;  %v2044_v22 = vpop.f32.mrb[6].mxu0 }
 0x135   : > { %1565 = vst [vmem:[%s2524_s9 + $0x28] sm:$0xff] %v2056_v19  ;;  %v2059_v23 = vadd.f32 %v1988_v21, %v1686_v62  ;;  %v937_v24 = vpop.f32.mrb[7].mxu1  ;;  %v1543_v25 = vpop.f32.mrb[7].mxu0 }
 0x136   : > { %1564 = vst [vmem:[%s2524_s9 + $0x20] sm:$0xff] %v2058_v20  ;;  %v2061_v26 = vadd.f32 %v1686_v62, %v937_v24 }
 0x137   : > { %v2060_v27 = vadd.f32 %v2059_v23, %v2044_v22 }
 0x138   : > { %v2062_v28 = vadd.f32 %v2061_v26, %v1543_v25 }
 0x139   : > { %1567 = vst [vmem:[%s2524_s9 + $0x38] sm:$0xff] %v2060_v27 }
 0x13a   : > { %1566 = vst [vmem:[%s2524_s9 + $0x30] sm:$0xff] %v2062_v28 }
 0x13b   : > { %2190 = shalt.err (!%p2187_p5)
}
 0x13c   : > { %s2191_s29 = scalar_lea.hbm %s2537_s21, 1024  ;;  %s2195_s5 = scalar_lea.hbm %s2594_s3, 2048 }
 0x13d   : > { %p2192_p6 = scmp.ne.s32.totalorder %s2537_s21, %s2191_s29  ;;  %p2196_p10 = scmp.lt.u32.totalorder %s2537_s21, %s2594_s3 }
 0x13e   : > { %p2197_p11 = scmp.lt.u32.totalorder %s2195_s5, %s2191_s29  ;;  %p2199_p13 = scmp.lt.u32.totalorder %s2191_s29, %s2537_s21 }
 0x13f   : > { %p2193_p7 = pnand %p2192_p6, %p2320_p4 }
 0x140   : > { %p2198_p12 = por %p2197_p11, %p2196_p10 }
 0x141   : > { %p2194_p9 = pneg %p2193_p7 }
 0x142   : > { %p2200_p0 = por %p2199_p13, %p2198_p12 }
 0x144   : > { %p2201_p1 = pnand %p2200_p0, %p2194_p9 }
 0x146   : > { %2204 = shalt.err (!%p2201_p1)
}
 0x147   : > { %s2258_s8 = smov 128   ;;  %s2259_s9 = smov 8  }
 0x148   : > { %2120 = dma.vmem_to_hbm [thread:$0]  (%p2320_p4), %s2539_s11, 1024, %s2537_s21, %s2545_s15, %s2258_s8, %s2258_s8, %s2259_s9  }
 0x149 PF: > { %p2126_p2 = scmp.ge.s32.totalorder %s2255_s17, 2  ;;  %s1599_s10 = sand.u32 1, %s2235_s12  }
 0x14a   : > { %s1600_s18 = scalar_lea.sflag [#allocation3], %s1599_s10 }
 0x14b   : > { %p2123_p3 = pnand %p2126_p2, %p2327_p8 }
 0x14d   : > { %2230 = dma.done.wait (!%p2123_p3), %s1600_s18, 1024  }
 0x14e   : > { %2232 = vsyncadd (!%p2123_p3), %s1600_s18, 4294966272  ;;  %s16_s17 = sadd.s32 1, %s2255_s17   ;;  %s2597_s12 = smov %s2239_s13 }
 0x14f   : > { %p13_p5 = scmp.ge.s32.totalorder %s16_s17, 4   ;;  %s2598_s13 = smov %s2243_s14 }
 0x150   : > { %s2599_s14 = smov %s2333_s25  ;;  %s2600_s15 = smov %s2251_s16 }
 0x151   : > { %s2601_s16 = smov %s2603_s20  ;;  %15 = sbr.rel (!%p13_p5) target bundleno = 4 (0x4), region = 81 }
 0x158   :  { %1605 = vsyncpa [#allocation3], 1 }
 0x159   :  { %1607 = vsyncpa [#allocation3 + $0x1], 1 }

</bundles_post_ra>
